<compile_context>
chip_gen: v7x
topology: tpu7x:2x2x1
jax: 0.10.0
libtpu: 0.0.40
codegen_flags: <defaults>
</compile_context>

<pallas_src>
import functools
import math

import jax
import jax.numpy as jnp
from jax import lax
from jax.experimental import pallas as pl
from jax.experimental.pallas import tpu as pltpu


def _flash_attention_kernel(
    kvt_ref,     # SMEM (B*num_q_tiles,) int32 : kv tiles needed per (b, q-tile)
    tmin_ref,    # SMEM (B*num_q_tiles,) int32 : min valid len per (b, q-tile)
    vlen_ref,    # VMEM (1, TILE_Q, 1) int32   : per-query valid lens
    q_ref,       # VMEM (1, TILE_Q, d)
    k_ref,       # VMEM (1, TILE_K, d)
    v_ref,       # VMEM (1, TILE_K, dvp)
    o_ref,       # VMEM (1, TILE_Q, dvp)
    m_sc,        # VMEM (TILE_Q, 1) f32  running max
    l_sc,        # VMEM (TILE_Q, 1) f32  running denom
    acc_sc,      # VMEM (TILE_Q, dvp) f32
    qs_sc,       # VMEM (TILE_Q, d) mm_dtype : pre-scaled q (hoisted out of kv loop)
    *,
    mm_dtype,
):
    b = pl.program_id(0)
    qt = pl.program_id(1)
    kv = pl.program_id(2)
    num_q_tiles = pl.num_programs(1)
    num_kv = pl.num_programs(2)
    tile_k = k_ref.shape[1]
    idx = b * num_q_tiles + qt

    @pl.when(kv == 0)
    def _init():
        m_sc[...] = jnp.full_like(m_sc, -jnp.inf)
        l_sc[...] = jnp.zeros_like(l_sc)
        acc_sc[...] = jnp.zeros_like(acc_sc)
        # Scale q once per q tile (Tq*d VALU work) instead of once per kv step.
        inv_sqrt_d = jnp.float32(1.0 / math.sqrt(q_ref.shape[-1]))
        qs_sc[...] = (q_ref[0].astype(jnp.float32) * inv_sqrt_d).astype(mm_dtype)

    tiles_needed = kvt_ref[idx]
    tmin = tmin_ref[idx]
    kv_start = kv * tile_k

    # Skip KV tiles that are fully masked for every row of this q tile.
    # (tiles_needed already accounts for zero-length rows needing all tiles.)
    @pl.when(kv < tiles_needed)
    def _compute():
        k = k_ref[0].astype(mm_dtype)
        v = v_ref[0].astype(mm_dtype)

        # Contract on the last dims directly; no explicit k.T relayout.
        scores = lax.dot_general(
            qs_sc[...], k,
            dimension_numbers=(((1,), (1,)), ((), ())),
            preferred_element_type=jnp.float32)          # (TILE_Q, TILE_K) f32

        def update(s):
            m_prev = m_sc[...]
            m_new = jnp.maximum(m_prev, jnp.max(s, axis=-1, keepdims=True))
            alpha = jnp.exp(m_prev - m_new)
            p = jnp.exp(s - m_new)
            l_sc[...] = alpha * l_sc[...] + jnp.sum(p, axis=-1, keepdims=True)
            acc_sc[...] = alpha * acc_sc[...] + jnp.dot(
                p.astype(mm_dtype), v, preferred_element_type=jnp.float32)
            m_sc[...] = m_new

        # Fast path: the whole KV tile is valid for every row of this q tile.
        needs_mask = (kv_start + tile_k) > tmin

        @pl.when(needs_mask)
        def _masked():
            col = lax.broadcasted_iota(jnp.int32, scores.shape, 1) + kv_start
            vlen = vlen_ref[0]                            # (TILE_Q, 1) int32
            update(jnp.where(col < vlen, scores, jnp.float32(-1.0e6)))

        @pl.when(jnp.logical_not(needs_mask))
        def _unmasked():
            update(scores)

    @pl.when(kv == num_kv - 1)
    def _finalize():
        inv_l = pl.reciprocal(l_sc[...], approx=True)     # EUP slot, ~free
        o_ref[0] = (acc_sc[...] * inv_l).astype(o_ref.dtype)


def _pick_tile(n, preferred):
    """Largest tile <= preferred that divides n (prefer multiples of 128)."""
    if n <= preferred:
        return n
    for quantum in (128, 8):
        start = (min(preferred, n) // quantum) * quantum
        for cand in range(start, quantum - 1, -quantum):
            if n % cand == 0:
                return cand
    return n


def _vmem_capacity_bytes():
    try:
        info = pltpu.get_tpu_info()
        cap = getattr(info, "vmem_capacity_bytes", None)
        if cap:
            return int(cap)
    except Exception:
        pass
    return 64 * 1024 * 1024   # conservative (v7x per-TC VMEM)


def dot_product_attention(queries, keys, values, valid_lens=None, *,
                          tile_q=None, tile_k=None, matmul_dtype=None):
    """Pallas flash-style masked attention.

    queries: (B, Tq, d), keys: (B, Tk, d), values: (B, Tk, dv)
    valid_lens: None, (B,) int, or (B, Tq) int (per-query lengths).
    """
    B, Tq, d = queries.shape
    _, Tk, dv = values.shape

    # bf16 MXU path by default for f32 inputs (f32 accumulation throughout).
    if matmul_dtype is None:
        mm_dtype = jnp.bfloat16 if queries.dtype == jnp.float32 else queries.dtype
    else:
        mm_dtype = matmul_dtype

    # Lane-dense accumulator / output: pad dv up to a multiple of 128.
    dvp = ((dv + 127) // 128) * 128
    values_p = values if dvp == dv else jnp.pad(
        values, ((0, 0), (0, 0), (0, dvp - dv)))

    # --- tile selection ---------------------------------------------------
    TILE_Q = _pick_tile(Tq, tile_q if tile_q is not None else 512)
    # Keep B * num_q_tiles >= 2 so both v7x TensorCores stay busy.
    while (B * (Tq // TILE_Q) < 2 and TILE_Q >= 256 and TILE_Q % 2 == 0
           and Tq % (TILE_Q // 2) == 0):
        TILE_Q //= 2

    vmem_cap = _vmem_capacity_bytes()
    k_bytes = jnp.dtype(keys.dtype).itemsize
    v_bytes = jnp.dtype(values_p.dtype).itemsize
    q_bytes = jnp.dtype(queries.dtype).itemsize
    mm_bytes = jnp.dtype(mm_dtype).itemsize

    # K/V-resident mode: if the full K/V (double-buffered) plus the per-step
    # working set fits comfortably in this generation's VMEM, use TILE_K = Tk so
    # the K/V block index depends only on b and is never re-fetched per q tile.
    kv_resident = 2 * Tk * (d * k_bytes + dvp * v_bytes)
    working = (2 * TILE_Q * d * q_bytes          # q double-buffer
               + 2 * TILE_Q * dvp * q_bytes      # out double-buffer
               + TILE_Q * dvp * 4                # acc scratch
               + TILE_Q * d * mm_bytes           # scaled-q scratch
               + 4 * TILE_Q * Tk * 4)            # f32 score temporaries
    if tile_k is None and kv_resident + working <= int(0.55 * vmem_cap):
        TILE_K = Tk
    else:
        TILE_K = _pick_tile(Tk, tile_k if tile_k is not None else 512)

    num_q_tiles = Tq // TILE_Q
    num_kv_tiles = Tk // TILE_K

    # --- valid-length preprocessing ----------------------------------------
    if valid_lens is None:
        vlen2d = jnp.full((B, Tq), Tk, dtype=jnp.int32)
    else:
        valid_lens = jnp.asarray(valid_lens).astype(jnp.int32)
        if valid_lens.ndim == 1:
            vlen2d = jnp.broadcast_to(valid_lens[:, None], (B, Tq))
        else:
            vlen2d = valid_lens

    v3 = vlen2d.reshape(B, num_q_tiles, TILE_Q)
    tmax = jnp.max(v3, axis=-1)
    tmin = jnp.minimum(jnp.min(v3, axis=-1), Tk)
    # Rows with valid_len == 0 must see ALL Tk keys (uniform softmax), so any
    # tile containing such a row needs every kv tile computed.
    needed_len = jnp.where(tmin == 0, Tk, tmax)
    tiles_needed = jnp.clip((needed_len + TILE_K - 1) // TILE_K, 1, num_kv_tiles)
    tiles_needed = tiles_needed.reshape(-1).astype(jnp.int32)
    tile_min = tmin.reshape(-1).astype(jnp.int32)
    vlen_rows = vlen2d.reshape(B, Tq, 1).astype(jnp.int32)

    # --- block specs --------------------------------------------------------
    def q_like_idx(b, qt, kv, kvt_ref, tmin_ref):
        return (b, qt, 0)

    def kv_idx(b, qt, kv, kvt_ref, tmin_ref):
        # Clamp the KV block index once the remaining tiles are fully masked so
        # the pipeline stops issuing redundant DMAs (same block index => no
        # refetch).  When TILE_K == Tk this is constant in qt -> K/V resident.
        last = kvt_ref[b * num_q_tiles + qt] - 1
        return (b, jnp.minimum(kv, last), 0)

    grid_spec = pltpu.PrefetchScalarGridSpec(
        num_scalar_prefetch=2,                 # tiles_needed, tile_min in SMEM
        grid=(B, num_q_tiles, num_kv_tiles),
        in_specs=[
            pl.BlockSpec((1, TILE_Q, 1), q_like_idx),     # per-query lens
            pl.BlockSpec((1, TILE_Q, d), q_like_idx),     # q
            pl.BlockSpec((1, TILE_K, d), kv_idx),         # k
            pl.BlockSpec((1, TILE_K, dvp), kv_idx),       # v (lane-dense padded)
        ],
        out_specs=pl.BlockSpec((1, TILE_Q, dvp), q_like_idx),
        scratch_shapes=[
            pltpu.VMEM((TILE_Q, 1), jnp.float32),         # m (running max)
            pltpu.VMEM((TILE_Q, 1), jnp.float32),         # l (running denom)
            pltpu.VMEM((TILE_Q, dvp), jnp.float32),       # acc
            pltpu.VMEM((TILE_Q, d), mm_dtype),            # scaled q
        ],
    )

    kernel = functools.partial(_flash_attention_kernel, mm_dtype=mm_dtype)

    out = pl.pallas_call(
        kernel,
        out_shape=jax.ShapeDtypeStruct((B, Tq, dvp), queries.dtype),
        grid_spec=grid_spec,
        compiler_params=pltpu.CompilerParams(
            dimension_semantics=("parallel", "parallel", "arbitrary"),
            vmem_limit_bytes=int(0.9 * vmem_cap)),
    )(tiles_needed, tile_min, vlen_rows, queries, keys, values_p)

    if dvp != dv:
        out = out[..., :dv]
    return out


def _reference(queries, keys, values, valid_lens, matmul_dtype=jnp.bfloat16):
    """Pure-JAX reference mirroring the PyTorch module (eval mode), with the
    matmul operands at the same precision as the kernel (bf16 in, f32 acc)."""
    d = queries.shape[-1]
    qs = (queries.astype(jnp.float32) * (1.0 / math.sqrt(d))).astype(matmul_dtype)
    scores = jnp.einsum("bqd,bkd->bqk", qs, keys.astype(matmul_dtype),
                        preferred_element_type=jnp.float32)
    if valid_lens is not None:
        Tk = scores.shape[-1]
        if valid_lens.ndim == 1:
            vl = valid_lens[:, None, None]
        else:
            vl = valid_lens[:, :, None]
        mask = jnp.arange(Tk, dtype=jnp.int32)[None, None, :] < vl
        scores = jnp.where(mask, scores, -1000000.0)
    weights = jax.nn.softmax(scores, axis=-1)
    out = jnp.einsum("bqk,bkv->bqv", weights.astype(matmul_dtype),
                     values.astype(matmul_dtype),
                     preferred_element_type=jnp.float32)
    return out.astype(queries.dtype)


if __name__ == "__main__":
    root = jax.random.PRNGKey(0)

    def run_case(name, B, Tq, Tk, d, dv, valid_lens, key, **kw):
        kq, kk, kv_ = jax.random.split(key, 3)
        q = jax.random.normal(kq, (B, Tq, d), dtype=jnp.float32)
        k = jax.random.normal(kk, (B, Tk, d), dtype=jnp.float32)
        v = jax.random.normal(kv_, (B, Tk, dv), dtype=jnp.float32)

        out = dot_product_attention(q, k, v, valid_lens, **kw)
        out = jax.block_until_ready(out)
        ref = _reference(q, k, v, valid_lens)

        assert out.shape == (B, Tq, dv), f"shape mismatch: {name}"
        err = float(jnp.max(jnp.abs(out - ref)))
        # bf16 matmuls (kernel and matched-precision reference) -> 2e-2 tolerance.
        assert jnp.allclose(out, ref, atol=2e-2, rtol=2e-2), \
            f"mismatch {name}: max|err|={err}"

    k1, k2, k3, k4, k5 = jax.random.split(root, 5)

    # 1) Module-docstring-sized case, 1-D valid_lens.
    run_case("tiny_1d", 2, 8, 8, 32, 32, jnp.array([3, 8], dtype=jnp.int32), k1)

    # 2) Multi-tile online softmax + masked-KV-tile skip + an all-masked batch
    #    (valid_len == 0 -> uniform over all keys).
    run_case("tiled_skip_1d", 2, 256, 256, 64, 64,
             jnp.array([60, 0], dtype=jnp.int32), k2, tile_q=128, tile_k=128)

    # 3) Per-query (2-D) valid_lens, including zero-length rows mixed into
    #    tiles that also contain non-zero rows.
    vl2d = jax.random.randint(k3, (2, 256), 1, 257).astype(jnp.int32)
    vl2d = vl2d.at[0, 7].set(0).at[1, 130].set(0)
    run_case("tiled_2d_mixed", 2, 256, 256, 64, 64, vl2d, k3,
             tile_q=128, tile_k=128)

    # 4) No masking, default (large / K-V-resident) tiles, lane-dense dv=128.
    run_case("nomask_resident", 2, 256, 256, 64, 128, None, k4)

    # 5) 2-D valid_lens with default tiling (single resident KV tile).
    vl2 = jax.random.randint(k5, (2, 256), 0, 257).astype(jnp.int32)
    run_case("resident_2d", 2, 256, 256, 64, 128, vl2, k5)

    print("KERNEL_OK")
</pallas_src>

<mosaic_0001>
module attributes {stable_mosaic.version = 11 : i64} {
  func.func @_flash_attention_kernel(%arg0: i32, %arg1: i32, %arg2: i32, %arg3: memref<2xi32, #tpu.memory_space<smem>>, %arg4: memref<2xi32, #tpu.memory_space<smem>>, %arg5: memref<1x8x1xi32, #tpu.memory_space<vmem>>, %arg6: memref<1x8x32xf32, #tpu.memory_space<vmem>>, %arg7: memref<1x8x32xf32, #tpu.memory_space<vmem>>, %arg8: memref<1x8x128xf32, #tpu.memory_space<vmem>>, %arg9: memref<1x8x128xf32, #tpu.memory_space<vmem>>, %arg10: memref<8x1xf32, #tpu.memory_space<vmem>>, %arg11: memref<8x1xf32, #tpu.memory_space<vmem>>, %arg12: memref<8x128xf32, #tpu.memory_space<vmem>>, %arg13: memref<8x32xbf16, #tpu.memory_space<vmem>>) attributes {dimension_semantics = [#tpu.dimension_semantics<parallel>, #tpu.dimension_semantics<parallel>, #tpu.dimension_semantics<arbitrary>], iteration_bounds = array<i64: 2, 1, 1>, scalar_prefetch = 2 : i64, scratch_operands = 4 : i64, tpu.core_type = #tpu.core_type<tc>, window_params = [{transform_indices = @transform_0, window_bounds = array<i64: 1, 8, 1>}, {transform_indices = @transform_1, window_bounds = array<i64: 1, 8, 32>}, {transform_indices = @transform_2, window_bounds = array<i64: 1, 8, 32>}, {transform_indices = @transform_3, window_bounds = array<i64: 1, 8, 128>}, {transform_indices = @transform_4, window_bounds = array<i64: 1, 8, 128>}]} {
    %c1_i32 = arith.constant 1 : i32
    %0 = arith.muli %arg0, %c1_i32 : i32
    %1 = arith.addi %0, %arg1 : i32
    %c0_i32 = arith.constant 0 : i32
    %2 = arith.cmpi eq, %arg2, %c0_i32 : i32
    %3 = arith.extui %2 : i1 to i32
    %c0_i32_0 = arith.constant 0 : i32
    %4 = arith.cmpi ne, %3, %c0_i32_0 : i32
    scf.if %4 {
      %cst = arith.constant 0xFF800000 : f32
      %16 = vector.broadcast %cst : f32 to vector<8x1xf32>
      %c0 = arith.constant 0 : index
      %c0_4 = arith.constant 0 : index
      %17 = vector.load %arg10[%c0, %c0_4] : memref<8x1xf32, #tpu.memory_space<vmem>>, vector<8x1xf32>
      tpu.vector_store %arg10[%c0, %c0_4], %16 {strides = array<i32>} : memref<8x1xf32, #tpu.memory_space<vmem>>, vector<8x1xf32>,
      %cst_5 = arith.constant 0.000000e+00 : f32
      %18 = vector.broadcast %cst_5 : f32 to vector<8x1xf32>
      %c0_6 = arith.constant 0 : index
      %c0_7 = arith.constant 0 : index
      %19 = vector.load %arg11[%c0_6, %c0_7] : memref<8x1xf32, #tpu.memory_space<vmem>>, vector<8x1xf32>
      tpu.vector_store %arg11[%c0_6, %c0_7], %18 {strides = array<i32>} : memref<8x1xf32, #tpu.memory_space<vmem>>, vector<8x1xf32>,
      %cst_8 = arith.constant 0.000000e+00 : f32
      %20 = vector.broadcast %cst_8 : f32 to vector<8x128xf32>
      %c0_9 = arith.constant 0 : index
      %c0_10 = arith.constant 0 : index
      %21 = vector.load %arg12[%c0_9, %c0_10] : memref<8x128xf32, #tpu.memory_space<vmem>>, vector<8x128xf32>
      tpu.vector_store %arg12[%c0_9, %c0_10], %20 {strides = array<i32>} : memref<8x128xf32, #tpu.memory_space<vmem>>, vector<8x128xf32>,
      %c0_11 = arith.constant 0 : index
      %c0_12 = arith.constant 0 : index
      %c0_13 = arith.constant 0 : index
      %22 = vector.load %arg6[%c0_11, %c0_12, %c0_13] : memref<1x8x32xf32, #tpu.memory_space<vmem>>, vector<1x8x32xf32>
      %23 = vector.shape_cast %22 : vector<1x8x32xf32> to vector<8x32xf32>
      %cst_14 = arith.constant 0.176776692 : f32
      %24 = vector.broadcast %cst_14 : f32 to vector<8x32xf32>
      %25 = arith.mulf %23, %24 : vector<8x32xf32>
      %26 = arith.truncf %25 : vector<8x32xf32> to vector<8x32xbf16>
      %c0_15 = arith.constant 0 : index
      %c0_16 = arith.constant 0 : index
      %27 = vector.load %arg13[%c0_15, %c0_16] : memref<8x32xbf16, #tpu.memory_space<vmem>>, vector<8x32xbf16>
      tpu.vector_store %arg13[%c0_15, %c0_16], %26 {strides = array<i32>} : memref<8x32xbf16, #tpu.memory_space<vmem>>, vector<8x32xbf16>,
    } else {
    }
    %5 = arith.index_cast %1 : i32 to index
    %6 = memref.load %arg3[%5] : memref<2xi32, #tpu.memory_space<smem>>
    %7 = arith.index_cast %1 : i32 to index
    %8 = memref.load %arg4[%7] : memref<2xi32, #tpu.memory_space<smem>>
    %c8_i32 = arith.constant 8 : i32
    %9 = arith.muli %arg2, %c8_i32 : i32
    %10 = arith.cmpi slt, %arg2, %6 : i32
    %11 = arith.extui %10 : i1 to i32
    %c0_i32_1 = arith.constant 0 : i32
    %12 = arith.cmpi ne, %11, %c0_i32_1 : i32
    scf.if %12 {
      %c0 = arith.constant 0 : index
      %c0_4 = arith.constant 0 : index
      %c0_5 = arith.constant 0 : index
      %16 = vector.load %arg7[%c0, %c0_4, %c0_5] : memref<1x8x32xf32, #tpu.memory_space<vmem>>, vector<1x8x32xf32>
      %17 = vector.shape_cast %16 : vector<1x8x32xf32> to vector<8x32xf32>
      %18 = arith.truncf %17 : vector<8x32xf32> to vector<8x32xbf16>
      %c0_6 = arith.constant 0 : index
      %c0_7 = arith.constant 0 : index
      %c0_8 = arith.constant 0 : index
      %19 = vector.load %arg8[%c0_6, %c0_7, %c0_8] : memref<1x8x128xf32, #tpu.memory_space<vmem>>, vector<1x8x128xf32>
      %20 = vector.shape_cast %19 : vector<1x8x128xf32> to vector<8x128xf32>
      %21 = arith.truncf %20 : vector<8x128xf32> to vector<8x128xbf16>
      %c0_9 = arith.constant 0 : index
      %c0_10 = arith.constant 0 : index
      %22 = vector.load %arg13[%c0_9, %c0_10] : memref<8x32xbf16, #tpu.memory_space<vmem>>, vector<8x32xbf16>
      %cst = arith.constant dense<0.000000e+00> : vector<8x8xf32>
      %23 = tpu.matmul %22, %18, %cst {dimension_numbers = #tpu.dot_dimension_numbers<[1], [1], [0], [0], [0, 0, 1, 0], [], []>} : vector<8x32xbf16>, vector<8x32xbf16>, vector<8x8xf32> -> vector<8x8xf32>
      %c8_i32_11 = arith.constant 8 : i32
      %24 = arith.addi %9, %c8_i32_11 : i32
      %25 = arith.cmpi sgt, %24, %8 : i32
      %26 = arith.extui %25 : i1 to i32
      %c0_i32_12 = arith.constant 0 : i32
      %27 = arith.cmpi ne, %26, %c0_i32_12 : i32
      scf.if %27 {
        %31 = tpu.iota {dimensions = array<i32: 1>} : vector<8x8xi32>
        %32 = vector.broadcast %9 : i32 to vector<8x8xi32>
        %33 = arith.addi %31, %32 : vector<8x8xi32>
        %c0_14 = arith.constant 0 : index
        %c0_15 = arith.constant 0 : index
        %c0_16 = arith.constant 0 : index
        %34 = vector.load %arg5[%c0_14, %c0_15, %c0_16] : memref<1x8x1xi32, #tpu.memory_space<vmem>>, vector<1x8x1xi32>
        %35 = vector.shape_cast %34 : vector<1x8x1xi32> to vector<8x1xi32>
        %36 = vector.broadcast %35 : vector<8x1xi32> to vector<8x8xi32>
        %37 = arith.cmpi slt, %33, %36 : vector<8x8xi32>
        %cst_17 = arith.constant -1.000000e+06 : f32
        %38 = vector.broadcast %cst_17 : f32 to vector<8x8xf32>
        %39 = arith.select %37, %23, %38 : vector<8x8xi1>, vector<8x8xf32>
        %c0_18 = arith.constant 0 : index
        %c0_19 = arith.constant 0 : index
        %40 = vector.load %arg10[%c0_18, %c0_19] : memref<8x1xf32, #tpu.memory_space<vmem>>, vector<8x1xf32>
        %cst_20 = arith.constant dense<0xFF800000> : vector<8xf32>
        %41 = vector.multi_reduction <maximumf>, %39, %cst_20 [1] : vector<8x8xf32> to vector<8xf32>
        %42 = vector.shape_cast %41 : vector<8xf32> to vector<8x1xf32>
        %43 = arith.maximumf %40, %42 : vector<8x1xf32>
        %44 = arith.subf %40, %43 : vector<8x1xf32>
        %45 = math.exp %44 : vector<8x1xf32>
        %46 = vector.broadcast %43 : vector<8x1xf32> to vector<8x8xf32>
        %47 = arith.subf %39, %46 : vector<8x8xf32>
        %48 = math.exp %47 : vector<8x8xf32>
        %c0_21 = arith.constant 0 : index
        %c0_22 = arith.constant 0 : index
        %49 = vector.load %arg11[%c0_21, %c0_22] : memref<8x1xf32, #tpu.memory_space<vmem>>, vector<8x1xf32>
        %50 = arith.mulf %45, %49 : vector<8x1xf32>
        %cst_23 = arith.constant dense<0.000000e+00> : vector<8xf32>
        %51 = vector.multi_reduction <add>, %48, %cst_23 [1] : vector<8x8xf32> to vector<8xf32>
        %52 = vector.shape_cast %51 : vector<8xf32> to vector<8x1xf32>
        %53 = arith.addf %50, %52 : vector<8x1xf32>
        %c0_24 = arith.constant 0 : index
        %c0_25 = arith.constant 0 : index
        %54 = vector.load %arg11[%c0_24, %c0_25] : memref<8x1xf32, #tpu.memory_space<vmem>>, vector<8x1xf32>
        tpu.vector_store %arg11[%c0_24, %c0_25], %53 {strides = array<i32>} : memref<8x1xf32, #tpu.memory_space<vmem>>, vector<8x1xf32>,
        %c0_26 = arith.constant 0 : index
        %c0_27 = arith.constant 0 : index
        %55 = vector.load %arg12[%c0_26, %c0_27] : memref<8x128xf32, #tpu.memory_space<vmem>>, vector<8x128xf32>
        %56 = vector.broadcast %45 : vector<8x1xf32> to vector<8x128xf32>
        %57 = arith.mulf %56, %55 : vector<8x128xf32>
        %58 = arith.truncf %48 : vector<8x8xf32> to vector<8x8xbf16>
        %cst_28 = arith.constant dense<0.000000e+00> : vector<8x128xf32>
        %59 = tpu.matmul %58, %21, %cst_28 {dimension_numbers = #tpu.dot_dimension_numbers<[1], [0], [0], [1], [0, 0, 1, 1], [], []>} : vector<8x8xbf16>, vector<8x128xbf16>, vector<8x128xf32> -> vector<8x128xf32>
        %60 = arith.addf %57, %59 : vector<8x128xf32>
        %c0_29 = arith.constant 0 : index
        %c0_30 = arith.constant 0 : index
        %61 = vector.load %arg12[%c0_29, %c0_30] : memref<8x128xf32, #tpu.memory_space<vmem>>, vector<8x128xf32>
        tpu.vector_store %arg12[%c0_29, %c0_30], %60 {strides = array<i32>} : memref<8x128xf32, #tpu.memory_space<vmem>>, vector<8x128xf32>,
        %c0_31 = arith.constant 0 : index
        %c0_32 = arith.constant 0 : index
        %62 = vector.load %arg10[%c0_31, %c0_32] : memref<8x1xf32, #tpu.memory_space<vmem>>, vector<8x1xf32>
        tpu.vector_store %arg10[%c0_31, %c0_32], %43 {strides = array<i32>} : memref<8x1xf32, #tpu.memory_space<vmem>>, vector<8x1xf32>,
      } else {
      }
      %true = arith.constant true
      %28 = arith.xori %25, %true : i1
      %29 = arith.extui %28 : i1 to i32
      %c0_i32_13 = arith.constant 0 : i32
      %30 = arith.cmpi ne, %29, %c0_i32_13 : i32
      scf.if %30 {
        %c0_14 = arith.constant 0 : index
        %c0_15 = arith.constant 0 : index
        %31 = vector.load %arg10[%c0_14, %c0_15] : memref<8x1xf32, #tpu.memory_space<vmem>>, vector<8x1xf32>
        %cst_16 = arith.constant dense<0xFF800000> : vector<8xf32>
        %32 = vector.multi_reduction <maximumf>, %23, %cst_16 [1] : vector<8x8xf32> to vector<8xf32>
        %33 = vector.shape_cast %32 : vector<8xf32> to vector<8x1xf32>
        %34 = arith.maximumf %31, %33 : vector<8x1xf32>
        %35 = arith.subf %31, %34 : vector<8x1xf32>
        %36 = math.exp %35 : vector<8x1xf32>
        %37 = vector.broadcast %34 : vector<8x1xf32> to vector<8x8xf32>
        %38 = arith.subf %23, %37 : vector<8x8xf32>
        %39 = math.exp %38 : vector<8x8xf32>
        %c0_17 = arith.constant 0 : index
        %c0_18 = arith.constant 0 : index
        %40 = vector.load %arg11[%c0_17, %c0_18] : memref<8x1xf32, #tpu.memory_space<vmem>>, vector<8x1xf32>
        %41 = arith.mulf %36, %40 : vector<8x1xf32>
        %cst_19 = arith.constant dense<0.000000e+00> : vector<8xf32>
        %42 = vector.multi_reduction <add>, %39, %cst_19 [1] : vector<8x8xf32> to vector<8xf32>
        %43 = vector.shape_cast %42 : vector<8xf32> to vector<8x1xf32>
        %44 = arith.addf %41, %43 : vector<8x1xf32>
        %c0_20 = arith.constant 0 : index
        %c0_21 = arith.constant 0 : index
        %45 = vector.load %arg11[%c0_20, %c0_21] : memref<8x1xf32, #tpu.memory_space<vmem>>, vector<8x1xf32>
        tpu.vector_store %arg11[%c0_20, %c0_21], %44 {strides = array<i32>} : memref<8x1xf32, #tpu.memory_space<vmem>>, vector<8x1xf32>,
        %c0_22 = arith.constant 0 : index
        %c0_23 = arith.constant 0 : index
        %46 = vector.load %arg12[%c0_22, %c0_23] : memref<8x128xf32, #tpu.memory_space<vmem>>, vector<8x128xf32>
        %47 = vector.broadcast %36 : vector<8x1xf32> to vector<8x128xf32>
        %48 = arith.mulf %47, %46 : vector<8x128xf32>
        %49 = arith.truncf %39 : vector<8x8xf32> to vector<8x8xbf16>
        %cst_24 = arith.constant dense<0.000000e+00> : vector<8x128xf32>
        %50 = tpu.matmul %49, %21, %cst_24 {dimension_numbers = #tpu.dot_dimension_numbers<[1], [0], [0], [1], [0, 0, 1, 1], [], []>} : vector<8x8xbf16>, vector<8x128xbf16>, vector<8x128xf32> -> vector<8x128xf32>
        %51 = arith.addf %48, %50 : vector<8x128xf32>
        %c0_25 = arith.constant 0 : index
        %c0_26 = arith.constant 0 : index
        %52 = vector.load %arg12[%c0_25, %c0_26] : memref<8x128xf32, #tpu.memory_space<vmem>>, vector<8x128xf32>
        tpu.vector_store %arg12[%c0_25, %c0_26], %51 {strides = array<i32>} : memref<8x128xf32, #tpu.memory_space<vmem>>, vector<8x128xf32>,
        %c0_27 = arith.constant 0 : index
        %c0_28 = arith.constant 0 : index
        %53 = vector.load %arg10[%c0_27, %c0_28] : memref<8x1xf32, #tpu.memory_space<vmem>>, vector<8x1xf32>
        tpu.vector_store %arg10[%c0_27, %c0_28], %34 {strides = array<i32>} : memref<8x1xf32, #tpu.memory_space<vmem>>, vector<8x1xf32>,
      } else {
      }
    } else {
    }
    %c0_i32_2 = arith.constant 0 : i32
    %13 = arith.cmpi eq, %arg2, %c0_i32_2 : i32
    %14 = arith.extui %13 : i1 to i32
    %c0_i32_3 = arith.constant 0 : i32
    %15 = arith.cmpi ne, %14, %c0_i32_3 : i32
    scf.if %15 {
      %c0 = arith.constant 0 : index
      %c0_4 = arith.constant 0 : index
      %16 = vector.load %arg11[%c0, %c0_4] : memref<8x1xf32, #tpu.memory_space<vmem>>, vector<8x1xf32>
      %17 = tpu.reciprocal %16 {approx = true} : vector<8x1xf32> -> vector<8x1xf32>
      %c0_5 = arith.constant 0 : index
      %c0_6 = arith.constant 0 : index
      %18 = vector.load %arg12[%c0_5, %c0_6] : memref<8x128xf32, #tpu.memory_space<vmem>>, vector<8x128xf32>
      %19 = vector.broadcast %17 : vector<8x1xf32> to vector<8x128xf32>
      %20 = arith.mulf %18, %19 : vector<8x128xf32>
      %c0_7 = arith.constant 0 : index
      %c0_8 = arith.constant 0 : index
      %c0_9 = arith.constant 0 : index
      %21 = vector.load %arg9[%c0_7, %c0_8, %c0_9] : memref<1x8x128xf32, #tpu.memory_space<vmem>>, vector<1x8x128xf32>
      %22 = vector.shape_cast %21 : vector<1x8x128xf32> to vector<8x128xf32>
      %23 = vector.shape_cast %20 : vector<8x128xf32> to vector<1x8x128xf32>
      tpu.vector_store %arg9[%c0_7, %c0_8, %c0_9], %23 {strides = array<i32>} : memref<1x8x128xf32, #tpu.memory_space<vmem>>, vector<1x8x128xf32>,
    } else {
    }
    return
  }
  func.func @transform_0(%arg0: i32, %arg1: i32, %arg2: i32, %arg3: memref<2xi32, #tpu.memory_space<smem>>, %arg4: memref<2xi32, #tpu.memory_space<smem>>) -> (i32, i32, i32) {
    %c0_i32 = arith.constant 0 : i32
    %c0_i32_0 = arith.constant 0 : i32
    return %arg0, %arg1, %c0_i32 : i32, i32, i32
  }
  func.func @transform_1(%arg0: i32, %arg1: i32, %arg2: i32, %arg3: memref<2xi32, #tpu.memory_space<smem>>, %arg4: memref<2xi32, #tpu.memory_space<smem>>) -> (i32, i32, i32) {
    %c0_i32 = arith.constant 0 : i32
    %c0_i32_0 = arith.constant 0 : i32
    return %arg0, %arg1, %c0_i32 : i32, i32, i32
  }
  func.func @transform_2(%arg0: i32, %arg1: i32, %arg2: i32, %arg3: memref<2xi32, #tpu.memory_space<smem>>, %arg4: memref<2xi32, #tpu.memory_space<smem>>) -> (i32, i32, i32) {
    %c1_i32 = arith.constant 1 : i32
    %0 = arith.muli %arg0, %c1_i32 : i32
    %1 = arith.addi %0, %arg1 : i32
    %2 = arith.index_cast %1 : i32 to index
    %3 = memref.load %arg3[%2] : memref<2xi32, #tpu.memory_space<smem>>
    %c1_i32_0 = arith.constant 1 : i32
    %4 = arith.subi %3, %c1_i32_0 : i32
    %5 = arith.minsi %arg2, %4 : i32
    %c0_i32 = arith.constant 0 : i32
    %c0_i32_1 = arith.constant 0 : i32
    return %arg0, %5, %c0_i32 : i32, i32, i32
  }
  func.func @transform_3(%arg0: i32, %arg1: i32, %arg2: i32, %arg3: memref<2xi32, #tpu.memory_space<smem>>, %arg4: memref<2xi32, #tpu.memory_space<smem>>) -> (i32, i32, i32) {
    %c1_i32 = arith.constant 1 : i32
    %0 = arith.muli %arg0, %c1_i32 : i32
    %1 = arith.addi %0, %arg1 : i32
    %2 = arith.index_cast %1 : i32 to index
    %3 = memref.load %arg3[%2] : memref<2xi32, #tpu.memory_space<smem>>
    %c1_i32_0 = arith.constant 1 : i32
    %4 = arith.subi %3, %c1_i32_0 : i32
    %5 = arith.minsi %arg2, %4 : i32
    %c0_i32 = arith.constant 0 : i32
    %c0_i32_1 = arith.constant 0 : i32
    return %arg0, %5, %c0_i32 : i32, i32, i32
  }
  func.func @transform_4(%arg0: i32, %arg1: i32, %arg2: i32, %arg3: memref<2xi32, #tpu.memory_space<smem>>, %arg4: memref<2xi32, #tpu.memory_space<smem>>) -> (i32, i32, i32) {
    %c0_i32 = arith.constant 0 : i32
    %c0_i32_0 = arith.constant 0 : i32
    return %arg0, %arg1, %c0_i32 : i32, i32, i32
  }
}

</mosaic_0001>

<bundles_post_ra>
// kernel: tpu_custom_call.1
= control target key start
LH: loop header
LB: loop body
LE: loop exit
PB: predicated region body
PF: predicated region fallthrough
CT: control target
= control target key end

     0   :  { %s1469_s0 = inlined_call_operand.vmem [shape: s32[2], index: 0, kind: input, shape index: {}]   ;;  %s1470_s2 = inlined_call_operand.vmem [shape: s32[2,8,1], index: 2, kind: input, shape index: {}]   ;;  %s1471_s3 = inlined_call_operand.vmem [shape: f32[2,8,32], index: 3, kind: input, shape index: {}]   ;;  %s1472_s4 = inlined_call_operand.vmem [shape: f32[2,8,32], index: 4, kind: input, shape index: {}]   ;;  %s1473_s5 = inlined_call_operand.hbm [shape: f32[2,8,128], index: 5, kind: input, shape index: {}]   ;;  %s1474_s6 = inlined_call_operand.hbm [shape: f32[2,8,128], index: 6, kind: output, shape index: {}]   ;;  %s1475_s1 = inlined_call_operand.hbm [shape: s32[2], index: 1, kind: input, shape index: {}]  }
   0x1   :  { %1481 = sst [smem:[#allocation21_spill]] %s1470_s2  ;;  %s11_s23 = sshll.u32 %s1469_s0, 4  ;;  %s12_s23 = int_to_ptr.vmem [resolvable:$true] %s11_s23 }
   0x2   :  { %1482 = sst [smem:[#allocation22_spill]] %s1473_s5  ;;  %s983_s24 = scalar_lea.vmem %s12_s23, 16 }
   0x3   :  { %p984_p0 = scmp.ne.s32.totalorder %s12_s23, %s983_s24  ;;  %p988_p1 = scmp.lt.s32.totalorder %s12_s23, %s12_s23 }
   0x4   :  { %p989_p2 = scmp.lt.s32.totalorder %s983_s24, %s983_s24 }
   0x6   :  { %p990_p3 = por %p989_p2, %p988_p1 }
   0x8   :  { %p991_p4 = pnand %p990_p3, %p984_p0 }
   0xa   :  { %994 = shalt.err (!%p991_p4)  }
   0xb   :  { %s1145_s25 = smov [#allocation7]   ;;  %s995_s28 = scalar_lea.hbm %s1475_s1, 16 }
   0xc   :  { %14 = dma.vmem_to_smem %s12_s23, 16, %s1145_s25, [#allocation6] }
   0xd   :  { %p996_p5 = scmp.ne.s32.totalorder %s1475_s1, %s995_s28  ;;  %p999_p6 = scmp.lt.u32.totalorder %s995_s28, %s1475_s1 }
   0xf   :  { %p1001_p7 = pnand %p999_p6, %p996_p5 }
  0x11   :  { %1004 = shalt.err (!%p1001_p7)  }
  0x12   :  { %s1146_s8 = smov [#allocation8]  }
  0x13   :  { %16 = dma.hbm_to_smem %s1475_s1, 16, %s1146_s8, [#allocation6] }
  0x14   :  { %1099 = dma.done.wait [#allocation6], 32 }
  0x15   :  { %1100 = vsyncadd [#allocation6], 4294967264 }
  0x16   :  { %18 = sfence }
  0x17   :  { %19 = vsyncpa [#allocation10], 0 }
  0x18   :  { %21 = vsyncpa [#allocation10 + $0x1], 0 }
  0x19   :  { %22 = vsyncpa [#allocation11], 0 }
  0x1a   :  { %24 = vsyncpa [#allocation11 + $0x1], 0  ;;  %s1210_s11 = smov 0   ;;  %s1212_s12 = smov 0  }
  0x1b   :  { %s1214_s13 = smov 0   ;;  %s1216_s14 = smov 0  }
  0x1c   :  { %s1218_s15 = smov 0   ;;  %s1220_s16 = smov 0  }
  0x1d   :  { %s1222_s1 = smov 0   ;;  %s1224_s17 = smov 0  }
  0x1e   :  { %s1226_s18 = smov 0  }
  0x1f LB: > { %1483 = sst [smem:[#allocation18_spill]] %s1131_s16  ;;  %s49_s19 = sadd.s32 1, %s1139_s17  ;;  %s1143_s18 = sphi %s1226_s18, %s30_s18   ;;  %s1139_s17 = sphi %s1224_s17, %s1508_s17   ;;  %s1135_s1 = sphi %s1222_s1, %s1507_s1   ;;  %s1131_s16 = sphi %s1220_s16, %s1500_s16   ;;  %s1127_s15 = sphi %s1218_s15, %s1506_s15   ;;  %s1123_s14 = sphi %s1216_s14, %s1505_s14   ;;  %s1119_s13 = sphi %s1214_s13, %s1504_s13   ;;  %s1115_s12 = sphi %s1212_s12, %s1503_s12   ;;  %s1111_s11 = sphi %s1210_s11, %s1502_s11  }
  0x20   : > { %s148_s20 = sld [smem:[#allocation7 + %s1139_s17]]  ;;  %s801_s21 = sadd.s32 4294967295, %s1143_s18  }
  0x21   : > { %p51_p8 = scmp.ge.s32.totalorder %s49_s19, 2  ;;  %s802_s22 = sadd.s32 4294967294, %s1143_s18  }
  0x22   : > { %p169_p9 = scmp.ne.s32.totalorder %s1131_s16, %s1127_s15  ;;  %p170_p10 = scmp.eq.s32.totalorder %s1143_s18, 0 }
  0x23   : > { %s1510_s19 = smov (%p51_p8, %s49_s19), 0  ;;  %p175_p11 = scmp.ne.s32.totalorder %s1127_s15, %s1123_s14 }
  0x24   : > { %1484 = sst [smem:[#allocation19_spill]] %s1510_s19  ;;  %s157_s24 = ssub.s32 %s1139_s17, %s1510_s19 }
  0x25   : > { %s153_s23 = sld [smem:[#allocation7 + %s1510_s19]]  ;;  %p176_p12 = scmp.eq.s32.totalorder %s801_s21, 0 }
  0x26   : > { %s807_s25 = sadd.s32 4294967295, %s148_s20  ;;  %p188_p0 = scmp.eq.s32.totalorder %s157_s24, 0 }
  0x27   : > { %p808_p13 = scmp.gt.s32.totalorder %s807_s25, 0  ;;  %p1266_p1 = por %p176_p12, %p175_p11 }
  0x28   : > { %s190_s27 = sadd.s32 1, %s1119_s13  ;;  %p200_p2 = scmp.ne.s32.totalorder %s1119_s13, %s1115_s12 }
  0x29   : > { %s1485_s26 = scalar_select %p1266_p1, 1, 0 }
  0x2a   : > { %s1512_s25 = smov (%p808_p13, %s807_s25), 0  ;;  %p201_p4 = scmp.eq.s32.totalorder %s801_s21, 1 }
  0x2b   : > { %s1272_s28 = scalar_select %p188_p0, %s1119_s13, %s190_s27  }
  0x2c   : > { %s809_s29 = sadd.s32 4294967295, %s153_s23  ;;  %p206_p5 = scmp.ne.s32.totalorder %s1115_s12, %s1111_s11 }
  0x2d   : > { %p810_p3 = scmp.gt.s32.totalorder %s809_s29, 0  ;;  %p207_p6 = scmp.eq.s32.totalorder %s802_s22, 1 }
  0x2e   : > { %p1278_p7 = por %p201_p4, %p200_p2  ;;  %s162_s9 = sadd.s32 1, %s1131_s16 }
  0x2f   : > { %s1514_s29 = smov (%p810_p3, %s809_s29), 0  ;;  %p1282_p8 = por %p207_p6, %p206_p5 }
  0x30   : > { %s1486_s30 = scalar_select %p1278_p7, 1, 0 }
  0x31   : > { %s1487_s7 = scalar_select %p1282_p8, 1, 0 }
  0x32   : > { %s158_s0 = ssub.s32 %s1512_s25, %s1514_s29  ;;  %p171_p13 = por %p170_p10, %p169_p9 }
  0x33   : > { %s159_s8 = sor.u32 %s158_s0, %s157_s24  ;;  %p881_p0 = scmp.lt.s32.totalorder %s1143_s18, 2 }
  0x34   : > { %p160_p12 = scmp.eq.s32.totalorder %s159_s8, 0  ;;  %s267_s22 = sand.u32 1, %s1131_s16  }
  0x35   : > { %p1297_p2 = pnand %p881_p0, %p171_p13  ;;  %p817_p3 = scmp.ge.s32.totalorder %s1143_s18, 1 }
  0x36   : > { %s1295_s10 = scalar_select %p160_p12, %s1131_s16, %s162_s9  }
  0x37   : > { %s865_s20 = scalar_select %p171_p13, [#allocation7], [#allocation13] }
  0x38   : > { %1488 = sst [smem:[#allocation20_spill]] %s1295_s10  ;;  %p289_p4 = scmp.lt.s32.totalorder %s1143_s18, 3 }
  0x39   : > { %s866_s21 = scalar_select %p171_p13, %s1139_s17, 0 }
  0x3a   : > { %s1516_s20 = smov (!%p881_p0, %s865_s20), [#allocation14]  ;;  %s813_s24 = sshll.u32 %s267_s22, 3 }
  0x3b   : > { %s1518_s21 = smov (!%p881_p0, %s866_s21), 0  ;;  %p1305_p9 = pnand %p817_p3, %p289_p4 }
  0x3c   : > { %s273_s23 = sld [smem:[%s1516_s20 + %s1518_s21]]  ;;  %s271_s29 = scalar_lea.vmem [#allocation9], %s813_s24 }
  0x3d   : > { %s284_s0 = sshll.u32 %s271_s29, 4  ;;  %s1491_s5 = sld [smem:[#allocation22_spill]]  ;;  %s1310_s0 = int_to_ptr.vmem [resolvable:$true] %s284_s0 }
  0x3e   : > { %s268_s10 = scalar_lea.sflag [#allocation10], %s267_s22  ;;  %p1007_p6 = pneg %p1297_p2 }
  0x42   : > { %s814_s27 = sadd.s32 4294967295, %s273_s23 }
  0x43   : > { %p815_p10 = scmp.gt.s32.totalorder %s814_s27, 0 }
  0x45   : > { %s1520_s27 = smov (%p815_p10, %s814_s27), 0 }
  0x46   : > { %s280_s8 = sadd.s32 %s1139_s17, %s1520_s27  ;;  %s1010_s27 = scalar_lea.hbm %s1491_s5, 256 }
  0x47   : > { %s816_s9 = sshll.u32 %s280_s8, 7 }
  0x48   : > { %s1315_s21 = scalar_lea.hbm %s1491_s5, %s816_s9 }
  0x49   : > { %s1005_s16 = scalar_lea.hbm %s1315_s21, 128  ;;  %p1011_p0 = scmp.lt.u32.totalorder %s1315_s21, %s1491_s5 }
  0x4a   : > { %p1006_p5 = scmp.ne.s32.totalorder %s1315_s21, %s1005_s16  ;;  %p1012_p3 = scmp.lt.u32.totalorder %s1010_s27, %s1005_s16 }
  0x4b   : > { %p1014_p10 = scmp.lt.u32.totalorder %s1005_s16, %s1315_s21 }
  0x4c   : > { %p1008_p12 = pnand %p1007_p6, %p1006_p5  ;;  %p1013_p4 = por %p1012_p3, %p1011_p0 }
  0x4e   : > { %p1009_p13 = pneg %p1008_p12  ;;  %p1015_p11 = por %p1014_p10, %p1013_p4 }
  0x50   : > { %p1016_p8 = pnand %p1015_p11, %p1009_p13 }
  0x52   : > { %1019 = shalt.err (!%p1016_p8)
}
  0x53   : > { %s1020_s22 = scalar_lea.vmem %s1310_s0, 128  ;;  %s1147_s8 = smov [#allocation9]  }
  0x54   : > { %p1021_p5 = scmp.ne.s32.totalorder %s1310_s0, %s1020_s22  ;;  %s1025_s9 = sshll.u32 %s1147_s8, 4  ;;  %s1026_s9 = int_to_ptr.vmem [resolvable:$false] %s1025_s9 }
  0x55   : > { %s1027_s20 = scalar_lea.vmem %s1026_s9, 256  ;;  %p1028_p1 = scmp.lt.s32.totalorder %s1310_s0, %s1026_s9 }
  0x56   : > { %p1023_p12 = pnand %p1021_p5, %p1007_p6  ;;  %p1029_p0 = scmp.lt.s32.totalorder %s1027_s20, %s1020_s22 }
  0x58   : > { %p1024_p7 = pneg %p1023_p12  ;;  %p1030_p3 = por %p1029_p0, %p1028_p1 }
  0x5a   : > { %p1031_p4 = pnand %p1030_p3, %p1024_p7 }
  0x5c   : > { %1034 = shalt.err (!%p1031_p4)
}
  0x5d   : > { %876 = dma.hbm_to_vmem [thread:$0]  (!%p1297_p2), %s1315_s21, 128, %s1310_s0, %s268_s10  }
  0x5e   : > { %293 = sbr.rel (%p1305_p9) target bundleno = 1509 (0x5e5), region = 36  ;;  %s295_s16 = sand.u32 (!%p1305_p9), 1, %s1127_s15  }
  0x5f   : > { %s1345_s23 = sshll.u32 (!%p1305_p9), %s295_s16, 3  ;;  %s296_s24 = scalar_lea.sflag (!%p1305_p9), [#allocation10], %s295_s16 }
  0x60   : > { %p1492_p8 = scmp.ne.s32.totalorder (!%p1305_p9), %s1485_s26, 0 }
  0x65   : > { %1102 = dma.done.wait (%p1492_p8), %s296_s24, 128  }
  0x66   : > { %1104 = vsyncadd (%p1492_p8), %s296_s24, 4294967168  ;;  %s1480_s10 = sand.u32 1, %s1115_s12   ;;  %vm392_vm0 = vcmask 7168   ;;  %p350_p1 = scmp.lt.s32.totalorder %s1135_s1, 1  ;;  %v1148_v0 = vmov -inf   ;;  %v1149_v1 = vmov 0.0  }
  0x67   : > { %s365_s14 = sld [smem:[#allocation7 + %s1135_s1]]  ;;  %393 = vst.msk [vmem:[#allocation2] sm:$0xff] %vm392_vm0, %v1148_v0  ;;  %394 = vst.msk [vmem:[#allocation3] sm:$0xff] %vm392_vm0, %v1149_v1  ;;  %s1363_s0 = sshll.u32 %s1480_s10, 3  ;;  %vm399_vm1 = vcmask 257024  }
  0x68   : > { %s401_s25 = sld [smem:[#allocation7 + %s1135_s1]]  ;;  %395 = vst [vmem:[#allocation4] sm:$0xff] %v1149_v1  ;;  %s349_s5 = scalar_lea.vmem [#allocation12], %s1363_s0 }
  0x69   : > { %s1359_s26 = sld [smem:[#allocation8 + %s1135_s1]] }
  0x6a   : > { %s351_s21 = scalar_select %p350_p1, %s1135_s1, 1 }
  0x6b   : > { %s1493_s2 = sld [smem:[#allocation21_spill]] }
  0x6c   : > { %s820_s19 = sshll.u32 %s351_s21, 3 }
  0x6d   : > { %s363_s16 = scalar_lea.vmem %s1471_s3, %s820_s19  ;;  %s822_s24 = sadd.s32 4294967295, %s365_s14 }
  0x6e   : > { %v396_v2 = vld [vmem:[%s363_s16] sm:$0xff]  ;;  %p823_p7 = scmp.gt.s32.totalorder %s822_s24, 0  ;;  %p825_p11 = scmp.lt.s32.totalorder %s822_s24, 0 }
  0x6f   : > { %v397_v3 = vmul.f32 0.17677669, %v396_v2  ;;  %p829_p2 = scmp.le.s32.totalorder %s401_s25, 0 }
  0x70   : > { %s1522_s24 = smov (%p823_p7, %s822_s24), 0  ;;  %s1494_s14 = scalar_lea.vmem (!%p829_p2), [#allocation9], %s1345_s23  ;;  %vm413_vm2 = vcmask (!%p829_p2), 261120   ;;  %v1150_v8 = vmov (!%p829_p2), 0.0   ;;  %vm1151_vm3 = vmmov (!%p829_p2), 0  }
  0x71   : > { %s1369_s8 = scalar_lea.vmem %s1493_s2, %s820_s19  ;;  %v398_v4 = vpack.c.bf16 %v397_v3, %v397_v3  ;;  %s1524_s24 = smov (!%p825_p11, %s1522_s24), 0  ;;  %v410_v5 = vld [vmem:[%s1494_s14] sm:$0xff] (!%p829_p2)  ;;  %847 = vmatprep.subr.bf16.mxu0 (!%p829_p2), %v1150_v8  ;;  %849 = vmatprep.mubr.msk.bf16.mxu0 (!%p829_p2), %vm1151_vm3, %v1150_v8 }
  0x72   : > { %s373_s10 = sadd.s32 %s1524_s24, %s351_s21  ;;  %407 = sbr.rel (%p829_p2) target bundleno = 1353 (0x549), region = 48  ;;  %v1380_v7 = vpack.c.bf16 (!%p829_p2), %v410_v5, %v410_v5 }
  0x73   : > { %400 = vst.msk [vmem:[#allocation5] sm:$0xf] %vm399_vm1, %v398_v4  ;;  %s827_s27 = sshll.u32 %s373_s10, 3  ;;  %p832_p9 = scmp.ge.s32.totalorder (!%p829_p2), %s1359_s26, 8 }
  0x74   : > { %s375_s2 = scalar_lea.vmem %s1472_s4, %s827_s27 }
  0x75   : > { %v408_v6 = vld [vmem:[%s375_s2] sm:$0xff] (!%p829_p2) }
  0x76   : > { %v409_v9 = vpack.c.bf16 (!%p829_p2), %v408_v6, %v408_v6 }
  0x78   : > { %v418_v10 = vsel (!%p829_p2), %vm413_vm2, %v409_v9, 0 }
  0x79   : > { %848 = vmatpush3.bf16.xpose.msra.mxu0 %v418_v10  ;;  %v469_v16 = vld [vmem:[%s1369_s8] sm:$0xff] (!%p832_p9)  ;;  %v1152_v17 = vmov (!%p832_p9), 0   ;;  %v465_v18 = vlaneseq (!%p832_p9)  ;;  %vm476_vm4 = vcmask (!%p832_p9), 64512   ;;  %vm511_vm6 = vcmask (!%p832_p9), 1043456   ;;  %v492_v37 = vld [vmem:[#allocation3] sm:$0xff] (!%p832_p9)  ;;  %v500_v41 = vld [vmem:[#allocation4] sm:$0xff] (!%p832_p9) }
  0x7a   : > { %v412_v11 = vld [vmem:[#allocation5] sm:$0xf]  ;;  %968 = vset.pattern.permute.xlu0 (!%p832_p9), %v1152_v17  ;;  %969 = vset.pattern.permute.xlu1 (!%p832_p9), %v1152_v17  ;;  %v475_v23 = vld [vmem:[#allocation2] sm:$0xff] (!%p832_p9)  ;;  %v1153_v28 = vmov (!%p832_p9), 0.0   ;;  %v513_v29 = vsel (!%p832_p9), %vm511_vm6, %v1380_v7, 0  ;;  %vm1154_vm7 = vmmov (!%p832_p9), 0  }
  0x7b   : > { %471 = vperm.xlu0 (!%p832_p9), %968, %v469_v16   ;;  %v466_v19 = vand.u32 (!%p832_p9), 127, %v465_v18  ;;  %853 = vmatprep.subr.bf16.mxu0 (!%p832_p9), %v1153_v28 }
  0x80   : > { %850 = vmatmul.mubr.msk.bf16.vlgmr.msra.gmra.mrb[0].mxu0 %vm413_vm2, %v412_v11 }
  0x81   : > { %854 = vmatpush3.bf16.msra.mxu0 (!%p832_p9), %v513_v29  ;;  %855 = vmatprep.mubr.msk.bf16.mxu0 (!%p832_p9), %vm1154_vm7, %v1153_v28 }
  0xfa   : > { %v472_v20 = vpop.permute.xlu0 (!%p832_p9), %471 }
  0xfb   : > { %vm473_vm5 = vcmp.lt.s32.totalorder (!%p832_p9), %v466_v19, %v472_v20 }
 0x150   : > { %464 = sbr.rel (%p832_p9) target bundleno = 846 (0x34e), region = 52 }
 0x153   : > { %v1382_v12 = vpop.f32.mrb[0].mxu0 }
 0x154   : > { %v851_v13 = vpop.f32.mrb[1].mxu0  ;;  %v474_v21 = vsel (!%p832_p9), %vm473_vm5, %v1382_v12, -1000000.0 }
 0x155   : > { %v457_v14 = vpop.f32.mrb[2].mxu0  ;;  %v477_v22 = vsel (!%p832_p9), %vm476_vm4, %v474_v21, -inf }
 0x156   : > { %v852_v15 = vpop.f32.mrb[3].mxu0  ;;  %478 = vmax.xlane.f32.xlu0 (!%p832_p9), %v477_v22 }
 0x1e3   : > { %v479_v24 = vpop.xlane.xlu0 %478 }
 0x1e4   : > { %v480_v25 = vmax.f32 %v475_v23, %v479_v24 }
 0x1e6   : > { %v481_v26 = vsub.f32 %v475_v23, %v480_v25  ;;  %557 = vst.msk [vmem:[#allocation2] sm:$0xff] %vm392_vm0, %v480_v25  ;;  %486 = vperm.xlu1 %969, %v480_v25  }
 0x1e8   : > { %v482_v27 = vmul.f32 1.442695, %v481_v26 }
 0x1ea   : > { %970 = vpow2.f32 %v482_v27 }
 0x1f4   : > { %v971_v30 = vpop.eup %970 }
 0x1f5   : > { %503 = vperm.xlu0 %968, %v971_v30   ;;  %v493_v38 = vmul.f32 %v971_v30, %v492_v37 }
 0x265   : > { %v487_v31 = vpop.permute.xlu1 %486 }
 0x266   : > { %v489_v32 = vsub.f32 %v474_v21, %v487_v31 }
 0x268   : > { %v490_v33 = vmul.f32 1.442695, %v489_v32 }
 0x26a   : > { %972 = vpow2.f32 %v490_v33 }
 0x274   : > { %v973_v34 = vpop.eup %972  ;;  %v504_v42 = vpop.permute.xlu0 %503 }
 0x275   : > { %v494_v35 = vsel %vm476_vm4, %v973_v34, 0.0  ;;  %v507_v36 = vpack.c.bf16 %v973_v34, %v973_v34  ;;  %v506_v43 = vmul.f32 %v504_v42, %v500_v41 }
 0x276   : > { %495 = vadd.xlane.f32.xlu1 %v494_v35 }
 0x277   : > { %856 = vmatmul.mubr.msk.bf16.vlgmr.msra.gmra.mrb[0].mxu0 %vm476_vm4, %v507_v36 }
 0x303   : > { %v496_v39 = vpop.xlane.xlu1 %495 }
 0x304   : > { %v497_v40 = vadd.f32 %v496_v39, %v493_v38 }
 0x306   : > { %499 = vst.msk [vmem:[#allocation3] sm:$0xff] %vm392_vm0, %v497_v40 }
 0x34a   : > { %v549_v44 = vpop.f32.mrb[0].mxu0 }
 0x34b   : > { %v555_v45 = vadd.f32 %v549_v44, %v506_v43  ;;  %v857_v46 = vpop.f32.mrb[1].mxu0 }
 0x34c   : > { %v552_v47 = vpop.f32.mrb[2].mxu0 }
 0x34d   : > { %556 = vst [vmem:[#allocation4] sm:$0xff] %v555_v45  ;;  %v858_v48 = vpop.f32.mrb[3].mxu0 }
 0x34e PF: > { %p835_p6 = scmp.lt.s32.totalorder %s1359_s26, 8 }
 0x34f   : > { %vm563_vm8 = vcmask (!%p835_p6), 64512   ;;  %v1155_v50 = vmov (!%p835_p6), 0   ;;  %v562_v51 = vld [vmem:[#allocation2] sm:$0xff] (!%p835_p6)  ;;  %vm598_vm9 = vcmask (!%p835_p6), 1043456   ;;  %v1156_v55 = vmov (!%p835_p6), 0.0   ;;  %v579_v1 = vld [vmem:[#allocation3] sm:$0xff] (!%p835_p6) }
 0x350   : > { %561 = sbr.rel (%p835_p6) target bundleno = 1353 (0x549), region = 56  ;;  %v564_v49 = vsel (!%p835_p6), %vm563_vm8, %v1382_v12, -inf  ;;  %974 = vset.pattern.permute.xlu0 (!%p835_p6), %v1155_v50  ;;  %975 = vset.pattern.permute.xlu1 (!%p835_p6), %v1155_v50  ;;  %v600_v56 = vsel (!%p835_p6), %vm598_vm9, %v1380_v7, 0  ;;  %vm1157_vm10 = vmmov (!%p835_p6), 0  }
 0x351   : > { %565 = vmax.xlane.f32.xlu0 (!%p835_p6), %v564_v49  ;;  %859 = vmatprep.subr.bf16.mxu0 (!%p835_p6), %v1156_v55 }
 0x352   : > { %861 = vmatprep.mubr.msk.bf16.mxu0 (!%p835_p6), %vm1157_vm10, %v1156_v55  ;;  %860 = vmatpush3.bf16.msra.mxu0 (!%p835_p6), %v600_v56 }
 0x354   : > { %v587_v5 = vld [vmem:[#allocation4] sm:$0xff] (!%p835_p6) }
 0x3de   : > { %v566_v52 = vpop.xlane.xlu0 %565 }
 0x3df   : > { %v567_v53 = vmax.f32 %v562_v51, %v566_v52 }
 0x3e1   : > { %v568_v54 = vsub.f32 %v562_v51, %v567_v53  ;;  %644 = vst.msk [vmem:[#allocation2] sm:$0xff] %vm392_vm0, %v567_v53  ;;  %573 = vperm.xlu0 %974, %v567_v53  }
 0x3e3   : > { %v569_v63 = vmul.f32 1.442695, %v568_v54 }
 0x460   : > { %v574_v57 = vpop.permute.xlu0 %573 }
 0x461   : > { %v576_v58 = vsub.f32 %v1382_v12, %v574_v57 }
 0x463   : > { %v577_v59 = vmul.f32 1.442695, %v576_v58 }
 0x465   : > { %976 = vpow2.f32 %v577_v59 }
 0x466   : > { %978 = vpow2.f32 %v569_v63 }
 0x46f   : > { %v977_v60 = vpop.eup %976 }
 0x470   : > { %v581_v61 = vsel %vm563_vm8, %v977_v60, 0.0  ;;  %v594_v62 = vpack.c.bf16 %v977_v60, %v977_v60  ;;  %v979_v0 = vpop.eup %978 }
 0x471   : > { %582 = vadd.xlane.f32.xlu1 %v581_v61  ;;  %v580_v2 = vmul.f32 %v979_v0, %v579_v1 }
 0x472   : > { %862 = vmatmul.mubr.msk.bf16.vlgmr.msra.gmra.mrb[0].mxu0 %vm563_vm8, %v594_v62 }
 0x482   : > { %590 = vperm.xlu1 %975, %v979_v0  }
 0x4fe   : > { %v583_v3 = vpop.xlane.xlu1 %582 }
 0x4ff   : > { %v584_v4 = vadd.f32 %v583_v3, %v580_v2 }
 0x501   : > { %586 = vst.msk [vmem:[#allocation3] sm:$0xff] %vm392_vm0, %v584_v4 }
 0x502   : > { %v591_v6 = vpop.permute.xlu1 %590 }
 0x503   : > { %v593_v7 = vmul.f32 %v591_v6, %v587_v5 }
 0x545   : > { %v636_v8 = vpop.f32.mrb[0].mxu0 }
 0x546   : > { %v642_v9 = vadd.f32 %v636_v8, %v593_v7  ;;  %v863_v10 = vpop.f32.mrb[1].mxu0 }
 0x547   : > { %v639_v11 = vpop.f32.mrb[2].mxu0 }
 0x548   : > { %643 = vst [vmem:[#allocation4] sm:$0xff] %v642_v9  ;;  %v864_v12 = vpop.f32.mrb[3].mxu0 }
 0x549 PF: > { %v648_v13 = vld [vmem:[#allocation3] sm:$0xff]  ;;  %v1158_v14 = vmov 0   ;;  %s838_s2 = sshll.u32 %s1135_s1, 7  ;;  %s673_s23 = sshll.u32 %s349_s5, 4  ;;  %s1410_s23 = int_to_ptr.vmem [resolvable:$true] %s673_s23 }
 0x54a   : > { %980 = vset.pattern.permute.xlu0 %v1158_v14  ;;  %981 = vrcp.f32 %v648_v13  ;;  %s1408_s25 = scalar_lea.hbm %s1474_s6, %s838_s2  ;;  %s1495_s26 = sand.u32 1, %s1115_s12  }
 0x54b   : > { %s659_s21 = scalar_lea.sflag [#allocation11], %s1495_s26  ;;  %s1035_s19 = scalar_lea.vmem %s1410_s23, 128 }
 0x54c   : > { %p1036_p13 = scmp.ne.s32.totalorder %s1410_s23, %s1035_s19  ;;  %p1496_p10 = scmp.ne.s32.totalorder %s1486_s30, 0 }
 0x54d   : > { %s1159_s1 = smov [#allocation12]  }
 0x54e   : > { %p1037_p5 = pnand %p1036_p13, %p1496_p10  ;;  %s1039_s8 = sshll.u32 %s1159_s1, 4  ;;  %s1040_s8 = int_to_ptr.vmem [resolvable:$false] %s1039_s8 }
 0x54f   : > { %v650_v16 = vld [vmem:[#allocation4] sm:$0xff]  ;;  %s1041_s9 = scalar_lea.vmem %s1040_s8, 256  ;;  %p1042_p0 = scmp.lt.s32.totalorder %s1410_s23, %s1040_s8 }
 0x550   : > { %p1038_p12 = pneg %p1037_p5  ;;  %p1043_p3 = scmp.lt.s32.totalorder %s1041_s9, %s1035_s19 }
 0x552   : > { %p1044_p4 = por %p1043_p3, %p1042_p0 }
 0x554   : > { %v982_v15 = vpop.eup %981  ;;  %p1045_p8 = pnand %p1044_p4, %p1038_p12 }
 0x555   : > { %653 = vperm.xlu0 %980, %v982_v15  }
 0x5d4   : > { %v654_v17 = vpop.permute.xlu0 %653 }
 0x5d5   : > { %v656_v18 = vmul.f32 %v654_v17, %v650_v16 }
 0x5d7   : > { %657 = vst [vmem:[%s349_s5] sm:$0xff] %v656_v18 }
 0x5d8   : > { %1048 = shalt.err (!%p1045_p8)
}
 0x5d9   : > { %s1049_s5 = scalar_lea.hbm %s1408_s25, 128  ;;  %s1053_s16 = scalar_lea.hbm %s1474_s6, 256 }
 0x5da   : > { %p1050_p1 = scmp.ne.s32.totalorder %s1408_s25, %s1049_s5  ;;  %p1054_p2 = scmp.lt.u32.totalorder %s1408_s25, %s1474_s6 }
 0x5db   : > { %p1055_p9 = scmp.lt.u32.totalorder %s1053_s16, %s1049_s5  ;;  %p1057_p13 = scmp.lt.u32.totalorder %s1049_s5, %s1408_s25 }
 0x5dc   : > { %p1051_p7 = pnand %p1050_p1, %p1496_p10 }
 0x5dd   : > { %p1056_p6 = por %p1055_p9, %p1054_p2 }
 0x5de   : > { %p1052_p11 = pneg %p1051_p7 }
 0x5df   : > { %p1058_p5 = por %p1057_p13, %p1056_p6 }
 0x5e1   : > { %p1059_p12 = pnand %p1058_p5, %p1052_p11 }
 0x5e3   : > { %1062 = shalt.err (!%p1059_p12)
}
 0x5e4   : > { %869 = dma.vmem_to_hbm [thread:$0]  (%p1496_p10), %s1410_s23, 128, %s1408_s25, %s659_s21  }
 0x5e5 PF: > { %s685_s22 = sand.u32 1, %s1111_s11   ;;  %p1497_p0 = scmp.ne.s32.totalorder %s1487_s7, 0 }
 0x5e6   : > { %p1498_p3 = scmp.ge.s32.totalorder %s1143_s18, 2  ;;  %s686_s14 = scalar_lea.sflag [#allocation11], %s685_s22 }
 0x5e8   : > { %p878_p4 = pnand %p1498_p3, %p1497_p0 }
 0x5ea   : > { %1106 = dma.done.wait (!%p878_p4), %s686_s14, 128  }
 0x5eb   : > { %1108 = vsyncadd (!%p878_p4), %s686_s14, 4294967168  ;;  %s30_s18 = sadd.s32 1, %s1143_s18   ;;  %s1499_s30 = sld [smem:[#allocation18_spill]] }
 0x5ec   : > { %p27_p8 = scmp.ge.s32.totalorder %s30_s18, 4   ;;  %s1500_s16 = sld [smem:[#allocation20_spill]] }
 0x5ed   : > { %s1501_s2 = sld [smem:[#allocation19_spill]]  ;;  %s1502_s11 = smov %s1115_s12 }
 0x5ee   : > { %s1503_s12 = smov %s1119_s13  ;;  %s1504_s13 = smov %s1272_s28 }
 0x5ef   : > { %s1505_s14 = smov %s1127_s15  ;;  %s1507_s1 = smov %s1139_s17 }
 0x5f0   :  { %29 = sbr.rel (!%p27_p8) target bundleno = 31 (0x1f), region = 110 }
 0x5f1   : > { %s1506_s15 = smov %s1499_s30 }
 0x5f3   : > { %s1508_s17 = smov %s1501_s2 }
 0x5f7   :  { %691 = vsyncpa [#allocation10], 1 }
 0x5f8   :  { %693 = vsyncpa [#allocation10 + $0x1], 1 }
 0x5f9   :  { %694 = vsyncpa [#allocation11], 1 }
 0x5fa   :  { %696 = vsyncpa [#allocation11 + $0x1], 1 }

</bundles_post_ra>
